<compile_context>
chip_gen: v7x
topology: tpu7x:2x2x1
jax: 0.10.0
libtpu: 0.0.40
codegen_flags: <defaults>
</compile_context>

<pallas_src>
import math
from functools import partial

import jax
import jax.numpy as jnp
from jax import lax
from jax.experimental import pallas as pl
from jax.experimental.pallas import tpu as pltpu


def _make_arc_kernel(s: float, m: float):
    cos_m = math.cos(m)
    sin_m = math.sin(m)
    th = math.cos(math.pi - m)
    mm = math.sin(math.pi - m) * m
    # F.normalize uses x / max(||x||, eps); with rsqrt the equivalent guard
    # is max(||x||^2, eps^2).
    eps2 = 1e-24

    def arc_kernel(x_ref, w_ref, lbl_ref, o_ref):
        x = x_ref[...].astype(jnp.float32)          # (B, D)       resident
        w = w_ref[...].astype(jnp.float32)          # (TILE_C, D)  streamed
        lbl = lbl_ref[...]                          # (B, 1) int32 resident

        # L2 normalization via rsqrt (EUP): v / max(||v||, eps).
        xn = x * lax.rsqrt(jnp.maximum(jnp.sum(x * x, axis=-1, keepdims=True), eps2))
        wn = w * lax.rsqrt(jnp.maximum(jnp.sum(w * w, axis=-1, keepdims=True), eps2))

        # cosine = xn @ wn.T, contracting D directly (no physical transpose).
        cosine = lax.dot_general(
            xn, wn,
            dimension_numbers=(((1,), (1,)), ((), ())),
            preferred_element_type=jnp.float32)     # (B, TILE_C)

        # sine = sqrt(clamp(1 - cos^2, 0, 1)); phi = cos(theta + m) w/ fallback.
        sine = jnp.sqrt(jnp.clip(1.0 - cosine * cosine, 0.0, 1.0))
        phi = cosine * cos_m - sine * sin_m
        phi = jnp.where(cosine > th, phi, cosine - mm)

        # One-hot select via lane iota offset by this tile's class base.
        B, TC = cosine.shape
        base = pl.program_id(0) * TC
        col_ids = base + lax.broadcasted_iota(jnp.int32, (B, TC), 1)
        out = jnp.where(col_ids == lbl, phi, cosine)

        o_ref[...] = (out * s).astype(o_ref.dtype)

    return arc_kernel


@partial(jax.jit, static_argnames=("s", "m", "tile_c"))
def arc_cell_forward(x, weight, label, s=30.0, m=0.5, tile_c=256):
    """x: (B, D) f32, weight: (C, D) f32 (nn.Linear layout), label: (B,) int."""
    B, D = x.shape
    C, D2 = weight.shape
    assert D == D2
    lbl = label.reshape(B, 1).astype(jnp.int32)

    # Pad C up to a multiple of tile_c (lane-dense, MXU-friendly output width).
    # Padded classes have zero weight -> cosine 0; labels never hit them, and
    # the padded columns are sliced off below.
    c_pad = -(-C // tile_c) * tile_c
    if c_pad != C:
        weight = jnp.pad(weight, ((0, c_pad - C), (0, 0)))
    n_tiles = c_pad // tile_c

    kernel = _make_arc_kernel(float(s), float(m))
    out = pl.pallas_call(
        kernel,
        out_shape=jax.ShapeDtypeStruct((B, c_pad), jnp.float32),
        grid=(n_tiles,),
        in_specs=[
            pl.BlockSpec((B, D), lambda j: (0, 0)),        # x: resident
            pl.BlockSpec((tile_c, D), lambda j: (j, 0)),   # weight: streamed over C
            pl.BlockSpec((B, 1), lambda j: (0, 0)),        # labels: resident
        ],
        out_specs=pl.BlockSpec((B, tile_c), lambda j: (0, j)),
        compiler_params=pltpu.CompilerParams(
            dimension_semantics=("parallel",)),            # 2 TCs on v7x
    )(x, weight, lbl)

    if c_pad != C:
        out = out[:, :C]
    return out


def _xavier_uniform(key, out_features, in_features):
    # matches torch nn.init.xavier_uniform_ for a 2-D weight
    bound = math.sqrt(6.0 / (in_features + out_features))
    return jax.random.uniform(
        key, (out_features, in_features), dtype=jnp.float32,
        minval=-bound, maxval=bound)


def _reference(x, weight, label, s=30.0, m=0.5):
    # pure-JAX reference mirroring the PyTorch forward
    eps = 1e-12
    xn = x / jnp.maximum(jnp.linalg.norm(x, axis=1, keepdims=True), eps)
    wn = weight / jnp.maximum(jnp.linalg.norm(weight, axis=1, keepdims=True), eps)
    cosine = xn @ wn.T
    sine = jnp.sqrt(jnp.clip(1.0 - cosine ** 2, 0.0, 1.0))
    phi = cosine * math.cos(m) - sine * math.sin(m)
    phi = jnp.where(cosine > math.cos(math.pi - m), phi,
                    cosine - math.sin(math.pi - m) * m)
    oh = jax.nn.one_hot(label, cosine.shape[1], dtype=jnp.float32)
    return (oh * phi + (1.0 - oh) * cosine) * s


if __name__ == "__main__":
    key = jax.random.PRNGKey(0)
    k_x, k_w, k_l = jax.random.split(key, 3)

    # Small but non-trivial shapes: exercises the C-grid (2 tiles of 256).
    B, D, C = 8, 64, 512   # batch, in_features, out_features (classes)
    x = jax.random.normal(k_x, (B, D), dtype=jnp.float32)
    weight = _xavier_uniform(k_w, C, D)
    label = jax.random.randint(k_l, (B,), 0, C, dtype=jnp.int32)

    out = arc_cell_forward(x, weight, label, s=30.0, m=0.5, tile_c=256)
    out = jax.block_until_ready(out)

    ref = _reference(x, weight, label, s=30.0, m=0.5)
    assert out.shape == (B, C)
    assert jnp.allclose(out, ref, atol=1e-4, rtol=1e-4), "mismatch vs reference"

    print("KERNEL_OK")
</pallas_src>

<mosaic_0001>
module attributes {stable_mosaic.version = 11 : i64} {
  func.func @arc_kernel(%arg0: i32, %arg1: memref<8x64xf32, #tpu.memory_space<vmem>>, %arg2: memref<256x64xf32, #tpu.memory_space<vmem>>, %arg3: memref<8x1xi32, #tpu.memory_space<vmem>>, %arg4: memref<8x256xf32, #tpu.memory_space<vmem>>) attributes {dimension_semantics = [#tpu.dimension_semantics<parallel>], iteration_bounds = array<i64: 2>, scalar_prefetch = 0 : i64, scratch_operands = 0 : i64, tpu.core_type = #tpu.core_type<tc>, window_params = [{pipeline_mode = #tpu.pipeline_mode<synchronous>, transform_indices = @transform_0, window_bounds = array<i64: 8, 64>}, {transform_indices = @transform_1, window_bounds = array<i64: 256, 64>}, {pipeline_mode = #tpu.pipeline_mode<synchronous>, transform_indices = @transform_2, window_bounds = array<i64: 8, 1>}, {transform_indices = @transform_3, window_bounds = array<i64: 8, 256>}]} {
    %c0 = arith.constant 0 : index
    %c0_0 = arith.constant 0 : index
    %0 = vector.load %arg1[%c0, %c0_0] : memref<8x64xf32, #tpu.memory_space<vmem>>, vector<8x64xf32>
    %c0_1 = arith.constant 0 : index
    %c0_2 = arith.constant 0 : index
    %1 = vector.load %arg2[%c0_1, %c0_2] : memref<256x64xf32, #tpu.memory_space<vmem>>, vector<256x64xf32>
    %c0_3 = arith.constant 0 : index
    %c0_4 = arith.constant 0 : index
    %2 = vector.load %arg3[%c0_3, %c0_4] : memref<8x1xi32, #tpu.memory_space<vmem>>, vector<8x1xi32>
    %3 = arith.mulf %0, %0 : vector<8x64xf32>
    %cst = arith.constant dense<0.000000e+00> : vector<8xf32>
    %4 = vector.multi_reduction <add>, %3, %cst [1] : vector<8x64xf32> to vector<8xf32>
    %5 = vector.shape_cast %4 : vector<8xf32> to vector<8x1xf32>
    %cst_5 = arith.constant 1.000000e-24 : f32
    %6 = vector.broadcast %cst_5 : f32 to vector<8x1xf32>
    %7 = arith.maximumf %5, %6 : vector<8x1xf32>
    %8 = math.rsqrt %7 : vector<8x1xf32>
    %9 = vector.broadcast %8 : vector<8x1xf32> to vector<8x64xf32>
    %10 = arith.mulf %0, %9 : vector<8x64xf32>
    %11 = arith.mulf %1, %1 : vector<256x64xf32>
    %cst_6 = arith.constant dense<0.000000e+00> : vector<256xf32>
    %12 = vector.multi_reduction <add>, %11, %cst_6 [1] : vector<256x64xf32> to vector<256xf32>
    %13 = vector.shape_cast %12 : vector<256xf32> to vector<256x1xf32>
    %cst_7 = arith.constant 1.000000e-24 : f32
    %14 = vector.broadcast %cst_7 : f32 to vector<256x1xf32>
    %15 = arith.maximumf %13, %14 : vector<256x1xf32>
    %16 = math.rsqrt %15 : vector<256x1xf32>
    %17 = vector.broadcast %16 : vector<256x1xf32> to vector<256x64xf32>
    %18 = arith.mulf %1, %17 : vector<256x64xf32>
    %cst_8 = arith.constant dense<0.000000e+00> : vector<8x256xf32>
    %19 = tpu.matmul %10, %18, %cst_8 {dimension_numbers = #tpu.dot_dimension_numbers<[1], [1], [0], [0], [0, 0, 1, 0], [], []>} : vector<8x64xf32>, vector<256x64xf32>, vector<8x256xf32> -> vector<8x256xf32>
    %20 = arith.mulf %19, %19 : vector<8x256xf32>
    %cst_9 = arith.constant 1.000000e+00 : f32
    %21 = vector.broadcast %cst_9 : f32 to vector<8x256xf32>
    %22 = arith.subf %21, %20 : vector<8x256xf32>
    %cst_10 = arith.constant 0.000000e+00 : f32
    %cst_11 = arith.constant 1.000000e+00 : f32
    %23 = vector.broadcast %cst_10 : f32 to vector<8x256xf32>
    %24 = arith.maximumf %23, %22 : vector<8x256xf32>
    %25 = vector.broadcast %cst_11 : f32 to vector<8x256xf32>
    %26 = arith.minimumf %25, %24 : vector<8x256xf32>
    %27 = math.sqrt %26 : vector<8x256xf32>
    %cst_12 = arith.constant 0.87758255 : f32
    %28 = vector.broadcast %cst_12 : f32 to vector<8x256xf32>
    %29 = arith.mulf %19, %28 : vector<8x256xf32>
    %cst_13 = arith.constant 0.47942555 : f32
    %30 = vector.broadcast %cst_13 : f32 to vector<8x256xf32>
    %31 = arith.mulf %27, %30 : vector<8x256xf32>
    %32 = arith.subf %29, %31 : vector<8x256xf32>
    %cst_14 = arith.constant -0.87758255 : f32
    %33 = vector.broadcast %cst_14 : f32 to vector<8x256xf32>
    %34 = arith.cmpf ogt, %19, %33 : vector<8x256xf32>
    %cst_15 = arith.constant 0.239712775 : f32
    %35 = vector.broadcast %cst_15 : f32 to vector<8x256xf32>
    %36 = arith.subf %19, %35 : vector<8x256xf32>
    %37 = arith.select %34, %32, %36 : vector<8x256xi1>, vector<8x256xf32>
    %c256_i32 = arith.constant 256 : i32
    %38 = arith.muli %arg0, %c256_i32 : i32
    %39 = tpu.iota {dimensions = array<i32: 1>} : vector<8x256xi32>
    %40 = vector.broadcast %38 : i32 to vector<8x256xi32>
    %41 = arith.addi %40, %39 : vector<8x256xi32>
    %42 = vector.broadcast %2 : vector<8x1xi32> to vector<8x256xi32>
    %43 = arith.cmpi eq, %41, %42 : vector<8x256xi32>
    %44 = arith.select %43, %37, %19 : vector<8x256xi1>, vector<8x256xf32>
    %cst_16 = arith.constant 3.000000e+01 : f32
    %45 = vector.broadcast %cst_16 : f32 to vector<8x256xf32>
    %46 = arith.mulf %44, %45 : vector<8x256xf32>
    %c0_17 = arith.constant 0 : index
    %c0_18 = arith.constant 0 : index
    %47 = vector.load %arg4[%c0_17, %c0_18] : memref<8x256xf32, #tpu.memory_space<vmem>>, vector<8x256xf32>
    tpu.vector_store %arg4[%c0_17, %c0_18], %46 {strides = array<i32>} : memref<8x256xf32, #tpu.memory_space<vmem>>, vector<8x256xf32>,
    return
  }
  func.func @transform_0(%arg0: i32) -> (i32, i32) {
    %c0_i32 = arith.constant 0 : i32
    %c0_i32_0 = arith.constant 0 : i32
    %c0_i32_1 = arith.constant 0 : i32
    return %c0_i32, %c0_i32_0 : i32, i32
  }
  func.func @transform_1(%arg0: i32) -> (i32, i32) {
    %c0_i32 = arith.constant 0 : i32
    %c0_i32_0 = arith.constant 0 : i32
    return %arg0, %c0_i32 : i32, i32
  }
  func.func @transform_2(%arg0: i32) -> (i32, i32) {
    %c0_i32 = arith.constant 0 : i32
    %c0_i32_0 = arith.constant 0 : i32
    %c0_i32_1 = arith.constant 0 : i32
    return %c0_i32, %c0_i32_0 : i32, i32
  }
  func.func @transform_3(%arg0: i32) -> (i32, i32) {
    %c0_i32 = arith.constant 0 : i32
    %c0_i32_0 = arith.constant 0 : i32
    return %c0_i32, %arg0 : i32, i32
  }
}

</mosaic_0001>

<bundles_post_ra>
// kernel: arc_cell_forward.1
= control target key start
LH: loop header
LB: loop body
LE: loop exit
PB: predicated region body
PF: predicated region fallthrough
CT: control target
= control target key end

     0   :  { %8 = vsyncpa [#allocation3], 0  ;;  %s1448_s0 = inlined_call_operand.vmem [shape: f32[8,64], index: 0, kind: input, shape index: {}]   ;;  %s1449_s1 = inlined_call_operand.vmem [shape: f32[512,64], index: 1, kind: input, shape index: {}]   ;;  %s1450_s2 = inlined_call_operand.vmem [shape: s32[8,1], index: 2, kind: input, shape index: {}]   ;;  %s1451_s3 = inlined_call_operand.hbm [shape: f32[8,512], index: 3, kind: output, shape index: {}]  }
   0x1   :  { %10 = vsyncpa [#allocation3 + $0x1], 0  ;;  %s1063_s12 = smov 0   ;;  %s1065_s13 = smov 0  }
   0x2   :  { %s1067_s14 = smov 0   ;;  %s1069_s15 = smov 0  }
   0x3 LB: > { %s1084_s16 = sadd.s32 4294967295, %s1039_s15   ;;  %s734_s17 = sadd.s32 4294967294, %s1039_s15   ;;  %s1039_s15 = sphi %s1069_s15, %s1459_s15   ;;  %s1035_s14 = sphi %s1067_s14, %s1458_s14   ;;  %s1031_s13 = sphi %s1065_s13, %s1457_s13   ;;  %s1027_s12 = sphi %s1063_s12, %s1456_s12  }
   0x4   : > { %s1088_s18 = sadd.s32 1, %s1039_s15   ;;  %s91_s19 = sadd.s32 1, %s1035_s14 }
   0x5   : > { %s88_s20 = ssub.s32 %s1039_s15, %s1088_s18  ;;  %p101_p0 = scmp.ne.s32.totalorder %s1035_s14, %s1031_s13 }
   0x6   : > { %p89_p1 = scmp.eq.s32.totalorder %s88_s20, 0  ;;  %p102_p2 = scmp.eq.s32.totalorder %s1084_s16, 1 }
   0x7   : > { %p107_p3 = scmp.ne.s32.totalorder %s1031_s13, %s1027_s12  ;;  %p108_p4 = scmp.eq.s32.totalorder %s734_s17, 1 }
   0x8   : > { %s1099_s21 = scalar_select %p89_p1, %s1035_s14, %s91_s19  }
   0x9   : > { %p1101_p5 = por %p102_p2, %p101_p0  ;;  %p1105_p6 = por %p108_p4, %p107_p3 }
   0xa   : > { %p737_p7 = scmp.ge.s32.totalorder %s1039_s15, 1  ;;  %p141_p8 = scmp.lt.s32.totalorder %s1039_s15, 3 }
   0xc   : > { %p142_p9 = pnand %p737_p7, %p141_p8 }
   0xd   : > { %s739_s24 = sshll.u32 (!%p142_p9), %s1084_s16, 5  ;;  %vm207_vm0 = vcmask (!%p142_p9), 523264   ;;  %s776_s6 = sshll.u32 (!%p142_p9), %s1084_s16, 8 }
   0xe   : > { %145 = sbr.rel (%p142_p9) target bundleno = 513 (0x201), region = 32  ;;  %p166_p10 = scmp.lt.s32.totalorder (!%p142_p9), %s739_s24, 63  ;;  %vm1324_vm1 = vmpackc.low (!%p142_p9), %vm207_vm0, %vm207_vm0 }
   0xf   : > { %s162_s7 = sand.u32 (!%p142_p9), 1, %s1031_s13   ;;  %s1404_s19 = scalar_lea.hbm (!%p142_p9), %s1451_s3, %s776_s6 }
  0x10   : > { %s738_s8 = sshll.u32 (!%p142_p9), %s162_s7, 4  ;;  %s661_s20 = scalar_lea.sflag (!%p142_p9), [#allocation3], %s162_s7 }
  0x11   : > { %s164_s9 = scalar_lea.vmem (!%p142_p9), [#allocation2], %s738_s8  ;;  %s1042_s16 = smov (!%p142_p9), [#allocation2]  }
  0x12   : > { %s675_s10 = sshll.u32 (!%p142_p9), %s164_s9, 4  ;;  %s1406_s10 = int_to_ptr.vmem [resolvable:$true] %s675_s10 }
  0x15   : > { %s1461_s24 = smov (!%p166_p10, %s739_s24), 63 }
  0x16   : > { %s740_s25 = sshll.u32 %s1461_s24, 3  ;;  %s977_s24 = scalar_lea.vmem %s1406_s10, 256 }
  0x17   : > { %s1115_s28 = scalar_lea.vmem %s1449_s1, %s740_s25  ;;  %p978_p11 = scmp.ne.s32.totalorder %s1406_s10, %s977_s24 }
  0x18   : > { %v1118_v0 = vld [vmem:[%s1115_s28 + $0x80] sm:$0xff]  ;;  %v1124_v2 = vld [vmem:[%s1115_s28 + $0x88] sm:$0xff]  ;;  %v1138_v8 = vld [vmem:[%s1115_s28 + $0x90] sm:$0xff]  ;;  %s981_s25 = sshll.u32 %s1042_s16, 4  ;;  %s982_s25 = int_to_ptr.vmem [resolvable:$false] %s981_s25 }
  0x19   : > { %v1121_v1 = vld [vmem:[%s1115_s28] sm:$0xff]  ;;  %v230_v3 = vmul.f32 %v1118_v0, %v1118_v0  ;;  %v231_v5 = vmul.f32 %v1124_v2, %v1124_v2  ;;  %v1133_v6 = vld [vmem:[%s1115_s28 + $0x8] sm:$0xff]  ;;  %v1141_v9 = vld [vmem:[%s1115_s28 + $0x98] sm:$0xff]  ;;  %v232_v14 = vmul.f32 %v1138_v8, %v1138_v8  ;;  %p979_p12 = pnand %p978_p11, %p1101_p5  ;;  %s983_s26 = scalar_lea.vmem %s982_s25, 512 }
  0x1a   : > { %v214_v4 = vmul.f32 %v1121_v1, %v1121_v1  ;;  %v215_v7 = vmul.f32 %v1133_v6, %v1133_v6  ;;  %v233_v15 = vmul.f32 %v1141_v9, %v1141_v9  ;;  %v1152_v16 = vld [vmem:[%s1115_s28 + $0x10] sm:$0xff]  ;;  %v1155_v17 = vld [vmem:[%s1115_s28 + $0x18] sm:$0xff]  ;;  %v1164_v22 = vld [vmem:[%s1115_s28 + $0xa0] sm:$0xff]  ;;  %p984_p0 = scmp.lt.s32.totalorder %s1406_s10, %s982_s25  ;;  %p985_p1 = scmp.lt.s32.totalorder %s983_s26, %s977_s24 }
  0x1b   : > { %v294_v10 = vsel %vm207_vm0, %v230_v3, 0.0  ;;  %v297_v12 = vsel %vm207_vm0, %v231_v5, 0.0  ;;  %v300_v18 = vsel %vm207_vm0, %v232_v14, 0.0  ;;  %v216_v20 = vmul.f32 %v1152_v16, %v1152_v16  ;;  %v1167_v23 = vld [vmem:[%s1115_s28 + $0xa8] sm:$0xff]  ;;  %v1176_v28 = vld [vmem:[%s1115_s28 + $0x20] sm:$0xff]  ;;  %v1188_v34 = vld [vmem:[%s1115_s28 + $0xb0] sm:$0xff]  ;;  %p980_p13 = pneg %p979_p12 }
  0x1c   : > { %v246_v11 = vsel %vm207_vm0, %v214_v4, 0.0  ;;  %295 = vadd.xlane.f32.xlu0 %v294_v10  ;;  %v249_v13 = vsel %vm207_vm0, %v215_v7, 0.0  ;;  %v303_v19 = vsel %vm207_vm0, %v233_v15, 0.0  ;;  %v217_v21 = vmul.f32 %v1155_v17, %v1155_v17  ;;  %v1179_v29 = vld [vmem:[%s1115_s28 + $0x28] sm:$0xff]  ;;  %v1191_v35 = vld [vmem:[%s1115_s28 + $0xb8] sm:$0xff]  ;;  %v1200_v40 = vld [vmem:[%s1115_s28 + $0x30] sm:$0xff]  ;;  %p986_p2 = por %p985_p1, %p984_p0 }
  0x1d   : > { %247 = vadd.xlane.f32.xlu1 %v246_v11  ;;  %v252_v24 = vsel %vm207_vm0, %v216_v20, 0.0  ;;  %v234_v26 = vmul.f32 %v1164_v22, %v1164_v22  ;;  %v235_v27 = vmul.f32 %v1167_v23, %v1167_v23  ;;  %v218_v32 = vmul.f32 %v1176_v28, %v1176_v28  ;;  %v1203_v41 = vld [vmem:[%s1115_s28 + $0x38] sm:$0xff]  ;;  %v1212_v46 = vld [vmem:[%s1115_s28 + $0xc0] sm:$0xff]  ;;  %v1215_v47 = vld [vmem:[%s1115_s28 + $0xc8] sm:$0xff] }
  0x1e   : > { %v255_v25 = vsel %vm207_vm0, %v217_v21, 0.0  ;;  %v219_v33 = vmul.f32 %v1179_v29, %v1179_v29  ;;  %v236_v38 = vmul.f32 %v1188_v34, %v1188_v34  ;;  %v237_v39 = vmul.f32 %v1191_v35, %v1191_v35  ;;  %v1224_v52 = vld [vmem:[%s1115_s28 + $0x40] sm:$0xff]  ;;  %v1227_v53 = vld [vmem:[%s1115_s28 + $0x48] sm:$0xff]  ;;  %v1236_v58 = vld [vmem:[%s1115_s28 + $0xd0] sm:$0xff]  ;;  %p987_p3 = pnand %p986_p2, %p980_p13 }
  0x1f   : > { %v306_v30 = vsel %vm207_vm0, %v234_v26, 0.0  ;;  %v309_v31 = vsel %vm207_vm0, %v235_v27, 0.0  ;;  %v258_v36 = vsel %vm207_vm0, %v218_v32, 0.0  ;;  %v220_v44 = vmul.f32 %v1200_v40, %v1200_v40  ;;  %v1239_v59 = vld [vmem:[%s1115_s28 + $0xd8] sm:$0xff]  ;;  %v1248_v3 = vld [vmem:[%s1115_s28 + $0x50] sm:$0xff]  ;;  %v1272_v20 = vld [vmem:[%s1115_s28 + $0x60] sm:$0xff] }
  0x20   : > { %298 = vadd.xlane.f32.xlu0 %v297_v12  ;;  %v261_v37 = vsel %vm207_vm0, %v219_v33, 0.0  ;;  %v312_v42 = vsel %vm207_vm0, %v236_v38, 0.0  ;;  %v315_v43 = vsel %vm207_vm0, %v237_v39, 0.0  ;;  %v221_v45 = vmul.f32 %v1203_v41, %v1203_v41  ;;  %v1251_v4 = vld [vmem:[%s1115_s28 + $0x58] sm:$0xff]  ;;  %v1260_v12 = vld [vmem:[%s1115_s28 + $0xe0] sm:$0xff]  ;;  %v1275_v21 = vld [vmem:[%s1115_s28 + $0x68] sm:$0xff] }
  0x21   : > { %250 = vadd.xlane.f32.xlu1 %v249_v13  ;;  %v264_v48 = vsel %vm207_vm0, %v220_v44, 0.0  ;;  %v238_v50 = vmul.f32 %v1212_v46, %v1212_v46  ;;  %v239_v51 = vmul.f32 %v1215_v47, %v1215_v47  ;;  %v222_v56 = vmul.f32 %v1224_v52, %v1224_v52  ;;  %v1263_v13 = vld [vmem:[%s1115_s28 + $0xe8] sm:$0xff]  ;;  %v1296_v38 = vld [vmem:[%s1115_s28 + $0x70] sm:$0xff]  ;;  %v1299_v39 = vld [vmem:[%s1115_s28 + $0x78] sm:$0xff] }
  0x22   : > { %v267_v49 = vsel %vm207_vm0, %v221_v45, 0.0  ;;  %v223_v57 = vmul.f32 %v1227_v53, %v1227_v53  ;;  %v240_v62 = vmul.f32 %v1236_v58, %v1236_v58  ;;  %v241_v63 = vmul.f32 %v1239_v59, %v1239_v59 }
  0x23   : > { %v318_v54 = vsel %vm207_vm0, %v238_v50, 0.0  ;;  %v321_v55 = vsel %vm207_vm0, %v239_v51, 0.0  ;;  %v270_v60 = vsel %vm207_vm0, %v222_v56, 0.0  ;;  %v224_v10 = vmul.f32 %v1248_v3, %v1248_v3 }
  0x24   : > { %301 = vadd.xlane.f32.xlu0 %v300_v18  ;;  %v273_v61 = vsel %vm207_vm0, %v223_v57, 0.0  ;;  %v324_v5 = vsel %vm207_vm0, %v240_v62, 0.0  ;;  %v327_v7 = vsel %vm207_vm0, %v241_v63, 0.0  ;;  %v225_v11 = vmul.f32 %v1251_v4, %v1251_v4 }
  0x25   : > { %304 = vadd.xlane.f32.xlu1 %v303_v19  ;;  %v276_v14 = vsel %vm207_vm0, %v224_v10, 0.0  ;;  %v242_v18 = vmul.f32 %v1260_v12, %v1260_v12  ;;  %v243_v19 = vmul.f32 %v1263_v13, %v1263_v13  ;;  %v226_v26 = vmul.f32 %v1272_v20, %v1272_v20 }
  0x26   : > { %v279_v15 = vsel %vm207_vm0, %v225_v11, 0.0  ;;  %v227_v27 = vmul.f32 %v1275_v21, %v1275_v21  ;;  %v228_v44 = vmul.f32 %v1296_v38, %v1296_v38  ;;  %v229_v45 = vmul.f32 %v1299_v39, %v1299_v39 }
  0x27   : > { %v282_v32 = vsel %vm207_vm0, %v226_v26, 0.0  ;;  %v1041_v56 = vmov 0  }
  0x28   : > { %253 = vadd.xlane.f32.xlu0 %v252_v24  ;;  %v330_v24 = vsel %vm207_vm0, %v242_v18, 0.0  ;;  %v285_v33 = vsel %vm207_vm0, %v227_v27, 0.0  ;;  %v291_v50 = vsel %vm207_vm0, %v229_v45, 0.0  ;;  %905 = vset.pattern.permute.xlu1 %v1041_v56 }
  0x29   : > { %256 = vadd.xlane.f32.xlu1 %v255_v25  ;;  %v333_v25 = vsel %vm207_vm0, %v243_v19, 0.0  ;;  %906 = vset.pattern.permute.xlu0 %v1041_v56 }
  0x2c   : > { %307 = vadd.xlane.f32.xlu0 %v306_v30  ;;  %v1284_v30 = vld [vmem:[%s1115_s28 + $0xf0] sm:$0xff] }
  0x2d   : > { %310 = vadd.xlane.f32.xlu1 %v309_v31  ;;  %v1287_v31 = vld [vmem:[%s1115_s28 + $0xf8] sm:$0xff] }
  0x30   : > { %259 = vadd.xlane.f32.xlu0 %v258_v36  ;;  %v244_v36 = vmul.f32 %v1284_v30, %v1284_v30 }
  0x31   : > { %262 = vadd.xlane.f32.xlu1 %v261_v37  ;;  %v245_v37 = vmul.f32 %v1287_v31, %v1287_v31 }
  0x34   : > { %313 = vadd.xlane.f32.xlu0 %v312_v42  ;;  %v336_v42 = vsel %vm207_vm0, %v244_v36, 0.0 }
  0x35   : > { %316 = vadd.xlane.f32.xlu1 %v315_v43  ;;  %v339_v43 = vsel %vm207_vm0, %v245_v37, 0.0 }
  0x38   : > { %265 = vadd.xlane.f32.xlu0 %v264_v48  ;;  %v1310_v48 = vld [vmem:[%s1448_s0] sm:$0xff] }
  0x39   : > { %268 = vadd.xlane.f32.xlu1 %v267_v49  ;;  %v288_v49 = vsel %vm207_vm0, %v228_v44, 0.0  ;;  %v206_v51 = vmul.f32 %v1310_v48, %v1310_v48 }
  0x3c   : > { %319 = vadd.xlane.f32.xlu0 %v318_v54  ;;  %v208_v54 = vsel %vm207_vm0, %v206_v51, 0.0 }
  0x3d   : > { %322 = vadd.xlane.f32.xlu1 %v321_v55  ;;  %v205_v55 = vld [vmem:[%s1450_s2] sm:$0xff] }
  0x40   : > { %271 = vadd.xlane.f32.xlu0 %v270_v60 }
  0x41   : > { %274 = vadd.xlane.f32.xlu1 %v273_v61 }
  0x44   : > { %325 = vadd.xlane.f32.xlu0 %v324_v5 }
  0x45   : > { %328 = vadd.xlane.f32.xlu1 %v327_v7 }
  0x48   : > { %277 = vadd.xlane.f32.xlu0 %v276_v14 }
  0x49   : > { %280 = vadd.xlane.f32.xlu1 %v279_v15 }
  0x4c   : > { %331 = vadd.xlane.f32.xlu0 %v330_v24 }
  0x4d   : > { %334 = vadd.xlane.f32.xlu1 %v333_v25 }
  0x50   : > { %283 = vadd.xlane.f32.xlu0 %v282_v32 }
  0x51   : > { %286 = vadd.xlane.f32.xlu1 %v285_v33 }
  0x54   : > { %337 = vadd.xlane.f32.xlu0 %v336_v42 }
  0x55   : > { %340 = vadd.xlane.f32.xlu1 %v339_v43 }
  0x58   : > { %289 = vadd.xlane.f32.xlu0 %v288_v49 }
  0x59   : > { %292 = vadd.xlane.f32.xlu1 %v291_v50  ;;  %v643_v50 = vlaneseq }
  0x5c   : > { %209 = vadd.xlane.f32.xlu0 %v208_v54 }
  0x6a   : > { %650 = vperm.xlu1 %905, %v205_v55  }
  0xa9   : > { %v296_v57 = vpop.xlane.xlu0 %295 }
  0xaa   : > { %v248_v60 = vpop.xlane.xlu1 %247  ;;  %v358_v61 = vmax.f32 %v296_v57, 1e-24 }
  0xab   : > { %v342_v62 = vmax.f32 %v248_v60, 1e-24 }
  0xac   : > { %907 = vrsqrt.f32 %v358_v61 }
  0xad   : > { %v299_v63 = vpop.xlane.xlu0 %298  ;;  %909 = vrsqrt.f32 %v342_v62 }
  0xae   : > { %v251_v5 = vpop.xlane.xlu1 %250  ;;  %v359_v7 = vmax.f32 %v299_v63, 1e-24 }
  0xaf   : > { %v343_v10 = vmax.f32 %v251_v5, 1e-24 }
  0xb0   : > { %911 = vrsqrt.f32 %v359_v7 }
  0xb1   : > { %913 = vrsqrt.f32 %v343_v10  ;;  %v302_v11 = vpop.xlane.xlu0 %301 }
  0xb2   : > { %v305_v14 = vpop.xlane.xlu1 %304  ;;  %v360_v15 = vmax.f32 %v302_v11, 1e-24 }
  0xb3   : > { %v361_v18 = vmax.f32 %v305_v14, 1e-24 }
  0xb4   : > { %915 = vrsqrt.f32 %v360_v15 }
  0xb5   : > { %917 = vrsqrt.f32 %v361_v18  ;;  %v254_v19 = vpop.xlane.xlu0 %253 }
  0xb6   : > { %v257_v24 = vpop.xlane.xlu1 %256  ;;  %v344_v25 = vmax.f32 %v254_v19, 1e-24  ;;  %v908_v27 = vpop.eup %907 }
  0xb7   : > { %v345_v26 = vmax.f32 %v257_v24, 1e-24  ;;  %v910_v32 = vpop.eup %909  ;;  %v422_v45 = vmul.f32 %v908_v27, %v1118_v0 }
  0xb8   : > { %919 = vrsqrt.f32 %v344_v25  ;;  %v406_v51 = vmul.f32 %v910_v32, %v1121_v1 }
  0xb9   : > { %921 = vrsqrt.f32 %v345_v26  ;;  %v308_v33 = vpop.xlane.xlu0 %307 }
  0xba   : > { %v311_v36 = vpop.xlane.xlu1 %310  ;;  %v912_v37 = vpop.eup %911  ;;  %v362_v42 = vmax.f32 %v308_v33, 1e-24 }
  0xbb   : > { %v363_v43 = vmax.f32 %v311_v36, 1e-24  ;;  %v914_v44 = vpop.eup %913  ;;  %v423_v49 = vmul.f32 %v912_v37, %v1124_v2 }
  0xbc   : > { %923 = vrsqrt.f32 %v362_v42  ;;  %v407_v54 = vmul.f32 %v914_v44, %v1133_v6 }
  0xbd   : > { %925 = vrsqrt.f32 %v363_v43  ;;  %v260_v55 = vpop.xlane.xlu0 %259  ;;  %v817_v57 = vpack.c.bf16 %v423_v49, %v422_v45 }
  0xbe   : > { %v263_v56 = vpop.xlane.xlu1 %262  ;;  %v916_v60 = vpop.eup %915  ;;  %v346_v61 = vmax.f32 %v260_v55, 1e-24  ;;  %v820_v62 = vpack.c.bf16 %v407_v54, %v406_v51 }
  0xbf   : > { %v347_v0 = vmax.f32 %v263_v56, 1e-24  ;;  %v918_v2 = vpop.eup %917  ;;  %819 = vmatprep.subr.msk.bf16.mxu0 %vm1324_vm1, %v817_v57  ;;  %v424_v63 = vmul.f32 %v916_v60, %v1138_v8 }
  0xc0   : > { %927 = vrsqrt.f32 %v346_v61  ;;  %822 = vmatpush3.bf16.xpose.msk.msra.mxu0 %vm1324_vm1, %v820_v62  ;;  %v425_v1 = vmul.f32 %v918_v2, %v1141_v9 }
  0xc1   : > { %929 = vrsqrt.f32 %v347_v0  ;;  %v314_v6 = vpop.xlane.xlu0 %313 }
  0xc2   : > { %v317_v5 = vpop.xlane.xlu1 %316  ;;  %v920_v7 = vpop.eup %919  ;;  %v364_v10 = vmax.f32 %v314_v6, 1e-24  ;;  %v823_v14 = vpack.c.bf16 %v425_v1, %v424_v63 }
  0xc3   : > { %v365_v11 = vmax.f32 %v317_v5, 1e-24  ;;  %v922_v15 = vpop.eup %921  ;;  %v408_v18 = vmul.f32 %v920_v7, %v1152_v16 }
  0xc4   : > { %931 = vrsqrt.f32 %v364_v10  ;;  %825 = vmatprep.subr.msk.bf16.mxu0 %vm1324_vm1, %v823_v14  ;;  %v409_v8 = vmul.f32 %v922_v15, %v1155_v17 }
  0xc5   : > { %933 = vrsqrt.f32 %v365_v11  ;;  %v266_v19 = vpop.xlane.xlu0 %265 }
  0xc6   : > { %v269_v24 = vpop.xlane.xlu1 %268  ;;  %v924_v9 = vpop.eup %923  ;;  %v348_v25 = vmax.f32 %v266_v19, 1e-24  ;;  %v826_v27 = vpack.c.bf16 %v409_v8, %v408_v18 }
  0xc7   : > { %v349_v26 = vmax.f32 %v269_v24, 1e-24  ;;  %v926_v32 = vpop.eup %925  ;;  %v426_v33 = vmul.f32 %v924_v9, %v1164_v22 }
  0xc8   : > { %935 = vrsqrt.f32 %v348_v25  ;;  %828 = vmatpush3.bf16.xpose.msk.msra.mxu0 %vm1324_vm1, %v826_v27  ;;  %v427_v16 = vmul.f32 %v926_v32, %v1167_v23 }
  0xc9   : > { %937 = vrsqrt.f32 %v349_v26  ;;  %v320_v36 = vpop.xlane.xlu0 %319 }
  0xca   : > { %v323_v37 = vpop.xlane.xlu1 %322  ;;  %v928_v17 = vpop.eup %927  ;;  %v366_v42 = vmax.f32 %v320_v36, 1e-24  ;;  %v829_v44 = vpack.c.bf16 %v427_v16, %v426_v33 }
  0xcb   : > { %v367_v43 = vmax.f32 %v323_v37, 1e-24  ;;  %v930_v45 = vpop.eup %929  ;;  %v410_v49 = vmul.f32 %v928_v17, %v1176_v28 }
  0xcc   : > { %939 = vrsqrt.f32 %v366_v42  ;;  %831 = vmatprep.subr.msk.bf16.mxu0 %vm1324_vm1, %v829_v44  ;;  %v411_v22 = vmul.f32 %v930_v45, %v1179_v29 }
  0xcd   : > { %941 = vrsqrt.f32 %v367_v43  ;;  %v272_v51 = vpop.xlane.xlu0 %271 }
  0xce   : > { %v275_v54 = vpop.xlane.xlu1 %274  ;;  %v932_v23 = vpop.eup %931  ;;  %v350_v55 = vmax.f32 %v272_v51, 1e-24  ;;  %v832_v57 = vpack.c.bf16 %v411_v22, %v410_v49 }
  0xcf   : > { %v351_v56 = vmax.f32 %v275_v54, 1e-24  ;;  %v934_v60 = vpop.eup %933  ;;  %v428_v61 = vmul.f32 %v932_v23, %v1188_v34 }
  0xd0   : > { %943 = vrsqrt.f32 %v350_v55  ;;  %834 = vmatpush3.bf16.xpose.msk.msra.mxu0 %vm1324_vm1, %v832_v57  ;;  %v429_v28 = vmul.f32 %v934_v60, %v1191_v35 }
  0xd1   : > { %945 = vrsqrt.f32 %v351_v56  ;;  %v326_v0 = vpop.xlane.xlu0 %325 }
  0xd2   : > { %v329_v62 = vpop.xlane.xlu1 %328  ;;  %v936_v29 = vpop.eup %935  ;;  %v368_v2 = vmax.f32 %v326_v0, 1e-24  ;;  %v835_v1 = vpack.c.bf16 %v429_v28, %v428_v61 }
  0xd3   : > { %v369_v63 = vmax.f32 %v329_v62, 1e-24  ;;  %v938_v6 = vpop.eup %937  ;;  %v412_v5 = vmul.f32 %v936_v29, %v1200_v40 }
  0xd4   : > { %947 = vrsqrt.f32 %v368_v2  ;;  %837 = vmatprep.subr.msk.bf16.mxu0 %vm1324_vm1, %v835_v1  ;;  %v413_v34 = vmul.f32 %v938_v6, %v1203_v41 }
  0xd5   : > { %949 = vrsqrt.f32 %v369_v63  ;;  %v278_v7 = vpop.xlane.xlu0 %277 }
  0xd6   : > { %v281_v10 = vpop.xlane.xlu1 %280  ;;  %v940_v35 = vpop.eup %939  ;;  %v352_v11 = vmax.f32 %v278_v7, 1e-24  ;;  %v838_v15 = vpack.c.bf16 %v413_v34, %v412_v5 }
  0xd7   : > { %v353_v14 = vmax.f32 %v281_v10, 1e-24  ;;  %v942_v18 = vpop.eup %941  ;;  %v430_v8 = vmul.f32 %v940_v35, %v1212_v46 }
  0xd8   : > { %951 = vrsqrt.f32 %v352_v11  ;;  %840 = vmatpush3.bf16.xpose.msk.msra.mxu0 %vm1324_vm1, %v838_v15  ;;  %v431_v40 = vmul.f32 %v942_v18, %v1215_v47 }
  0xd9   : > { %953 = vrsqrt.f32 %v353_v14  ;;  %v332_v19 = vpop.xlane.xlu0 %331 }
  0xda   : > { %v335_v24 = vpop.xlane.xlu1 %334  ;;  %v944_v41 = vpop.eup %943  ;;  %v370_v9 = vmax.f32 %v332_v19, 1e-24  ;;  %v841_v26 = vpack.c.bf16 %v431_v40, %v430_v8 }
  0xdb   : > { %v371_v25 = vmax.f32 %v335_v24, 1e-24  ;;  %v946_v27 = vpop.eup %945  ;;  %v414_v32 = vmul.f32 %v944_v41, %v1224_v52 }
  0xdc   : > { %955 = vrsqrt.f32 %v370_v9  ;;  %843 = vmatprep.subr.msk.bf16.mxu0 %vm1324_vm1, %v841_v26  ;;  %v415_v46 = vmul.f32 %v946_v27, %v1227_v53  ;;  %v644_v9 = vand.u32 127, %v643_v50 }
  0xdd   : > { %957 = vrsqrt.f32 %v371_v25  ;;  %v284_v33 = vpop.xlane.xlu0 %283  ;;  %v646_v25 = vstv %s776_s6 }
  0xde   : > { %v287_v16 = vpop.xlane.xlu1 %286  ;;  %v948_v47 = vpop.eup %947  ;;  %v354_v36 = vmax.f32 %v284_v33, 1e-24  ;;  %v844_v17 = vpack.c.bf16 %v415_v46, %v414_v32  ;;  %v645_v27 = vadd.s32 128, %v644_v9 }
  0xdf   : > { %v355_v37 = vmax.f32 %v287_v16, 1e-24  ;;  %v950_v42 = vpop.eup %949  ;;  %v432_v43 = vmul.f32 %v948_v47, %v1236_v58  ;;  %v647_v47 = vadd.s32 %v646_v25, %v644_v9 }
  0xe0   : > { %959 = vrsqrt.f32 %v354_v36  ;;  %846 = vmatpush3.bf16.xpose.msk.msra.mxu0 %vm1324_vm1, %v844_v17  ;;  %v433_v52 = vmul.f32 %v950_v42, %v1239_v59 }
  0xe1   : > { %961 = vrsqrt.f32 %v355_v37  ;;  %v338_v44 = vpop.xlane.xlu0 %337 }
  0xe2   : > { %v341_v45 = vpop.xlane.xlu1 %340  ;;  %v952_v53 = vpop.eup %951  ;;  %v372_v49 = vmax.f32 %v338_v44, 1e-24  ;;  %v847_v51 = vpack.c.bf16 %v433_v52, %v432_v43  ;;  %v648_v43 = vadd.s32 %v646_v25, %v645_v27 }
  0xe3   : > { %v373_v22 = vmax.f32 %v341_v45, 1e-24  ;;  %v954_v54 = vpop.eup %953  ;;  %v416_v23 = vmul.f32 %v952_v53, %v1248_v3 }
  0xe4   : > { %963 = vrsqrt.f32 %v372_v49  ;;  %849 = vmatprep.subr.msk.bf16.mxu0 %vm1324_vm1, %v847_v51  ;;  %v417_v58 = vmul.f32 %v954_v54, %v1251_v4 }
  0xe5   : > { %965 = vrsqrt.f32 %v373_v22  ;;  %v290_v55 = vpop.xlane.xlu0 %289 }
  0xe6   : > { %v293_v56 = vpop.xlane.xlu1 %292  ;;  %v956_v59 = vpop.eup %955  ;;  %v356_v57 = vmax.f32 %v290_v55, 1e-24  ;;  %v850_v61 = vpack.c.bf16 %v417_v58, %v416_v23 }
  0xe7   : > { %v357_v60 = vmax.f32 %v293_v56, 1e-24  ;;  %v958_v28 = vpop.eup %957  ;;  %v434_v0 = vmul.f32 %v956_v59, %v1260_v12 }
  0xe8   : > { %967 = vrsqrt.f32 %v356_v57  ;;  %852 = vmatpush3.bf16.xpose.msk.msra.mxu0 %vm1324_vm1, %v850_v61  ;;  %v435_v3 = vmul.f32 %v958_v28, %v1263_v13 }
  0xe9   : > { %969 = vrsqrt.f32 %v357_v60  ;;  %v210_v62 = vpop.xlane.xlu0 %209 }
  0xea   : > { %v960_v29 = vpop.eup %959  ;;  %v853_v4 = vpack.c.bf16 %v435_v3, %v434_v0  ;;  %v211_v2 = vmax.f32 %v210_v62, 1e-24  ;;  %v651_v52 = vpop.permute.xlu1 %650 }
  0xeb   : > { %v962_v63 = vpop.eup %961  ;;  %v418_v1 = vmul.f32 %v960_v29, %v1272_v20  ;;  %vm652_vm6 = vcmp.eq.s32.totalorder %v647_v47, %v651_v52  ;;  %vm653_vm8 = vcmp.eq.s32.totalorder %v648_v43, %v651_v52 }
  0xec   : > { %855 = vmatprep.subr.msk.bf16.mxu0 %vm1324_vm1, %v853_v4  ;;  %971 = vrsqrt.f32 %v211_v2  ;;  %v419_v12 = vmul.f32 %v962_v63, %v1275_v21 }
  0xee   : > { %v964_v6 = vpop.eup %963  ;;  %v856_v5 = vpack.c.bf16 %v419_v12, %v418_v1 }
  0xef   : > { %v966_v34 = vpop.eup %965  ;;  %v436_v7 = vmul.f32 %v964_v6, %v1284_v30 }
  0xf0   : > { %858 = vmatpush3.bf16.xpose.msk.msra.mxu0 %vm1324_vm1, %v856_v5  ;;  %v437_v13 = vmul.f32 %v966_v34, %v1287_v31 }
  0xf2   : > { %v968_v10 = vpop.eup %967  ;;  %v859_v35 = vpack.c.bf16 %v437_v13, %v436_v7 }
  0xf3   : > { %v970_v11 = vpop.eup %969  ;;  %v420_v20 = vmul.f32 %v968_v10, %v1296_v38 }
  0xf4   : > { %861 = vmatprep.subr.msk.bf16.mxu0 %vm1324_vm1, %v859_v35  ;;  %v421_v21 = vmul.f32 %v970_v11, %v1299_v39 }
  0xf6   : > { %v972_v14 = vpop.eup %971  ;;  %v862_v15 = vpack.c.bf16 %v421_v21, %v420_v20 }
  0xf7   : > { %v213_v18 = vmul.f32 %v972_v14, %v1310_v48 }
  0xf8   : > { %864 = vmatpush3.bf16.xpose.msk.msra.mxu0 %vm1324_vm1, %v862_v15 }
  0xf9   : > { %815 = vmatprep.mubr.msk.f32.mxu0 %vm207_vm0, %v213_v18 }
  0xff   : > { %816 = vmatmul.mubr.msk.f32.vlgmr.msra.gmra.mrb[0].mxu0 %vm207_vm0, %v213_v18 }
 0x1d2   : > { %v603_v30 = vpop.f32.mrb[0].mxu0 }
 0x1d3   : > { %v608_v31 = vmul.f32 %v603_v30, %v603_v30  ;;  %v605_v38 = vpop.f32.mrb[1].mxu0  ;;  %v630_v44 = vmul.f32 0.87758255, %v603_v30  ;;  %v774_v51 = vadd.f32 -0.23971277, %v603_v30 }
 0x1d4   : > { %v609_v8 = vmul.f32 %v605_v38, %v605_v38  ;;  %v631_v49 = vmul.f32 0.87758255, %v605_v38  ;;  %v775_v58 = vadd.f32 -0.23971277, %v605_v38  ;;  %vm636_vm7 = vcmp.gt.f32.partialorder %v603_v30, -0.87758255 }
 0x1d5   : > { %v610_v40 = vsub.f32 1.0, %v608_v31  ;;  %vm637_vm9 = vcmp.gt.f32.partialorder %v605_v38, -0.87758255 }
 0x1d6   : > { %v611_v39 = vsub.f32 1.0, %v609_v8 }
 0x1d7   : > { %v612_v19 = vmax.f32 %v610_v40, 0.0 }
 0x1d8   : > { %v613_v24 = vmax.f32 %v611_v39, 0.0 }
 0x1d9   : > { %v614_v41 = vmin.f32 %v612_v19, 1.0 }
 0x1da   : > { %v615_v48 = vmin.f32 %v613_v24, 1.0 }
 0x1db   : > { %973 = vrsqrt.f32 %v614_v41  ;;  %vm618_vm2 = vcmp.eq.f32.partialorder %v614_v41, inf  ;;  %v621_v16 = vand.u32 2147483648, %v614_v41  ;;  %vm620_vm4 = vcmp.eq.f32.partialorder %v614_v41, 0.0 }
 0x1dc   : > { %975 = vrsqrt.f32 %v615_v48  ;;  %vm625_vm3 = vcmp.eq.f32.partialorder %v615_v48, inf  ;;  %v628_v36 = vand.u32 2147483648, %v615_v48  ;;  %vm627_vm5 = vcmp.eq.f32.partialorder %v615_v48, 0.0 }
 0x1e5   : > { %v974_v26 = vpop.eup %973 }
 0x1e6   : > { %v976_v32 = vpop.eup %975  ;;  %v617_v46 = vmul.f32 %v974_v26, %v614_v41 }
 0x1e7   : > { %v624_v33 = vmul.f32 %v976_v32, %v615_v48 }
 0x1e8   : > { %v619_v37 = vsel %vm618_vm2, %v614_v41, %v617_v46 }
 0x1e9   : > { %v626_v17 = vsel %vm625_vm3, %v615_v48, %v624_v33  ;;  %v622_v42 = vsel %vm620_vm4, %v621_v16, %v619_v37 }
 0x1ea   : > { %v629_v45 = vsel %vm627_vm5, %v628_v36, %v626_v17  ;;  %v632_v53 = vmul.f32 0.47942555, %v622_v42 }
 0x1eb   : > { %v633_v22 = vmul.f32 0.47942555, %v629_v45 }
 0x1ec   : > { %v634_v54 = vsub.f32 %v630_v44, %v632_v53 }
 0x1ed   : > { %v635_v23 = vsub.f32 %v631_v49, %v633_v22 }
 0x1ee   : > { %v640_v55 = vsel %vm636_vm7, %v634_v54, %v774_v51 }
 0x1ef   : > { %v641_v56 = vsel %vm637_vm9, %v635_v23, %v775_v58  ;;  %v654_v59 = vsel %vm652_vm6, %v640_v55, %v603_v30 }
 0x1f0   : > { %v655_v57 = vsel %vm653_vm8, %v641_v56, %v605_v38  ;;  %v656_v60 = vmul.f32 30.0, %v654_v59 }
 0x1f1   : > { %v657_v61 = vmul.f32 30.0, %v655_v57 }
 0x1f2   : > { %658 = vst [vmem:[%s164_s9] sm:$0xff] %v656_v60 }
 0x1f3   : > { %659 = vst [vmem:[%s164_s9 + $0x8] sm:$0xff] %v657_v61 }
 0x1f4   : > { %990 = shalt.err (!%p987_p3)
}
 0x1f5   : > { %s991_s27 = scalar_lea.hbm %s1404_s19, 256  ;;  %s995_s30 = scalar_lea.hbm %s1451_s3, 512 }
 0x1f6   : > { %p992_p4 = scmp.ne.s32.totalorder %s1404_s19, %s991_s27  ;;  %p996_p9 = scmp.lt.u32.totalorder %s1404_s19, %s1451_s3 }
 0x1f7   : > { %p997_p10 = scmp.lt.u32.totalorder %s995_s30, %s991_s27  ;;  %p999_p12 = scmp.lt.u32.totalorder %s991_s27, %s1404_s19 }
 0x1f8   : > { %p993_p7 = pnand %p992_p4, %p1101_p5 }
 0x1f9   : > { %p998_p11 = por %p997_p10, %p996_p9 }
 0x1fa   : > { %p994_p8 = pneg %p993_p7 }
 0x1fb   : > { %p1000_p13 = por %p999_p12, %p998_p11 }
 0x1fd   : > { %p1001_p0 = pnand %p1000_p13, %p994_p8 }
 0x1ff   : > { %1004 = shalt.err (!%p1001_p0)
}
 0x200   : > { %865 = dma.vmem_to_hbm [thread:$0]  (%p1101_p5), %s1406_s10, 256, %s1404_s19, %s661_s20  }
 0x201 PF: > { %p871_p1 = scmp.ge.s32.totalorder %s1039_s15, 2  ;;  %s687_s6 = sand.u32 1, %s1027_s12  }
 0x202   : > { %s688_s7 = scalar_lea.sflag [#allocation3], %s687_s6 }
 0x203   : > { %p868_p2 = pnand %p871_p1, %p1105_p6 }
 0x205   : > { %1022 = dma.done.wait (!%p868_p2), %s688_s7, 256  }
 0x206   : > { %1024 = vsyncadd (!%p868_p2), %s688_s7, 4294967040  ;;  %p13_p3 = scmp.ge.s32.totalorder %s1088_s18, 4   ;;  %s1456_s12 = smov %s1031_s13 }
 0x207   : > { %s1457_s13 = smov %s1035_s14  ;;  %s1458_s14 = smov %s1099_s21 }
 0x208   : > { %s1459_s15 = smov %s1088_s18  ;;  %15 = sbr.rel (!%p13_p3) target bundleno = 3 (0x3), region = 67 }
 0x20f   :  { %693 = vsyncpa [#allocation3], 1 }
 0x210   :  { %695 = vsyncpa [#allocation3 + $0x1], 1 }

</bundles_post_ra>
